<compile_context>
chip_gen: v6e
topology: v6e:2x2x1
jax: 0.10.0
libtpu: 0.0.40
codegen_flags: <defaults>
</compile_context>

<pallas_src>
import math

import jax
import jax.numpy as jnp
from jax.experimental import pallas as pl
from jax.experimental.pallas import tpu as pltpu

_LANE = 128
_MAX_TILE_M = 512          # adj row tile upper bound
_MAX_TILE_K = 2048         # adj reduction (column) tile upper bound
_VMEM_BUDGET = 40 << 20    # per-step VMEM budget, safe within v7x's 64 MiB


def _round_up(x, m):
    return ((x + m - 1) // m) * m


def _largest_divisor_tile(total, cap):
    """Largest multiple of 128 that divides `total` (a multiple of 128), <= cap."""
    best = _LANE
    t = _LANE
    cap = max(cap, _LANE)
    while t <= min(total, cap):
        if total % t == 0:
            best = t
        t += _LANE
    return best


def _pick_tile_m(n_pad):
    """Largest 128-multiple divisor of n_pad <= 512, preferring >= 2 row tiles
    so the 'parallel' row axis can actually shard across both v7x TensorCores."""
    best = _LANE
    t = _LANE
    while t <= min(n_pad, _MAX_TILE_M):
        if n_pad % t == 0 and n_pad // t >= 2:
            best = t
        t += _LANE
    return best


def _maybe_cast_pad(a, dtype, pads):
    """Cast / pad only when required — avoids materializing extra HBM copies."""
    if a.dtype != jnp.dtype(dtype):
        a = a.astype(dtype)
    if any(p != 0 for _, p in pads):
        a = jnp.pad(a, pads)
    return a


# ---------------------------------------------------------------------------
# Kernel 1: support = X @ W   (computed once; tiled over rows and F_out)
# ---------------------------------------------------------------------------
def _support_kernel(x_ref, w_ref, o_ref):
    o_ref[...] = jnp.dot(
        x_ref[...], w_ref[...], preferred_element_type=jnp.float32
    ).astype(o_ref.dtype)


# ---------------------------------------------------------------------------
# Kernel 2: out = adj @ support (+ bias), grid = (row tiles, k tiles)
# ---------------------------------------------------------------------------
def _make_agg_kernel(tile_k, sup_resident, has_bias, acc_in_out):
    """Build the aggregation kernel for the given static configuration."""

    def kernel(*refs):
        refs = list(refs)
        adj_ref = refs.pop(0)
        sup_ref = refs.pop(0)
        b_ref = refs.pop(0) if has_bias else None
        o_ref = refs.pop(0)
        acc_ref = o_ref if acc_in_out else refs.pop(0)

        k = pl.program_id(1)

        # Fold the bias into the accumulator init (no separate epilogue add).
        @pl.when(k == 0)
        def _init():
            if has_bias:
                acc_ref[...] = jnp.broadcast_to(
                    b_ref[...].astype(jnp.float32), acc_ref.shape
                ).astype(acc_ref.dtype)
            else:
                acc_ref[...] = jnp.zeros_like(acc_ref)

        if sup_resident:
            # support is fully resident in VMEM: slice the k-th row chunk.
            start = pl.multiple_of(k * tile_k, _LANE)
            sup = sup_ref[pl.ds(start, tile_k), :]
        else:
            sup = sup_ref[...]

        acc_ref[...] += jnp.dot(
            adj_ref[...], sup, preferred_element_type=jnp.float32
        ).astype(acc_ref.dtype)

        if not acc_in_out:
            @pl.when(k == pl.num_programs(1) - 1)
            def _store():
                o_ref[...] = acc_ref[...].astype(o_ref.dtype)

    return kernel


# ---------------------------------------------------------------------------
# Wrapper
# ---------------------------------------------------------------------------
def gcn_forward(x, adj, weight, bias=None, *, compute_dtype=jnp.float32):
    """Pallas GCN forward.

    x: [N, F_in], adj: [N, N] (dense), weight: [F_in, F_out], bias: [F_out]|None.
    compute_dtype=f32 (default) gives strict parity with the PyTorch reference;
    compute_dtype=bf16 halves the adj HBM traffic (f32 MXU accumulation, bias in
    f32, single narrowing cast) at ~1e-2 relative error.
    """
    n, f_in = x.shape
    f_out = weight.shape[1]
    out_dtype = x.dtype

    csz = jnp.dtype(compute_dtype).itemsize
    osz = jnp.dtype(out_dtype).itemsize

    n_pad = _round_up(n, _LANE)
    f_in_pad = _round_up(f_in, _LANE)
    f_pad = _round_up(f_out, _LANE)

    # Cast / pad only when needed: with the default f32 path and N % 128 == 0,
    # adj goes into the kernel untouched (no extra full-matrix HBM copy).
    xc = _maybe_cast_pad(x, compute_dtype, ((0, n_pad - n), (0, f_in_pad - f_in)))
    adjc = _maybe_cast_pad(adj, compute_dtype, ((0, n_pad - n), (0, n_pad - n)))
    wc = _maybe_cast_pad(weight, compute_dtype,
                         ((0, f_in_pad - f_in), (0, f_pad - f_out)))

    # --- tile selection -----------------------------------------------------
    tile_m = _pick_tile_m(n_pad)
    tile_k = _largest_divisor_tile(n_pad, _MAX_TILE_K)

    has_bias = bias is not None
    acc_in_out = jnp.dtype(out_dtype) == jnp.dtype(jnp.float32)

    out_bytes = 2 * tile_m * f_pad * osz
    bias_bytes = 2 * f_pad * 4 if has_bias else 0
    acc_bytes = 0 if acc_in_out else tile_m * f_pad * 4

    def _adj_bytes(tk):
        return 2 * tile_m * tk * csz

    # Shrink the k tile only if the per-step footprint would blow the budget.
    while tile_k > _LANE and (
        _adj_bytes(tile_k) + out_bytes + bias_bytes + acc_bytes
        + 2 * tile_k * f_pad * csz
    ) > _VMEM_BUDGET:
        tile_k = _largest_divisor_tile(n_pad, tile_k - _LANE)

    # Keep the whole support resident in VMEM across the grid when it fits.
    base_bytes = _adj_bytes(tile_k) + out_bytes + bias_bytes + acc_bytes
    sup_resident_bytes = 2 * n_pad * f_pad * csz
    sup_resident = base_bytes + sup_resident_bytes <= _VMEM_BUDGET
    sup_bytes = sup_resident_bytes if sup_resident else 2 * tile_k * f_pad * csz

    # --- support = X @ W (computed once, outside the adj reduction loop) -----
    tile_f_sup = _largest_divisor_tile(f_pad, _MAX_TILE_K)
    while tile_f_sup > _LANE and 2 * f_in_pad * tile_f_sup * csz > (8 << 20):
        tile_f_sup = _largest_divisor_tile(f_pad, tile_f_sup - _LANE)

    support = pl.pallas_call(
        _support_kernel,
        out_shape=jax.ShapeDtypeStruct((n_pad, f_pad), compute_dtype),
        grid=(n_pad // tile_m, f_pad // tile_f_sup),
        in_specs=[
            pl.BlockSpec((tile_m, f_in_pad), lambda i, j: (i, 0)),
            pl.BlockSpec((f_in_pad, tile_f_sup), lambda i, j: (0, j)),
        ],
        out_specs=pl.BlockSpec((tile_m, tile_f_sup), lambda i, j: (i, j)),
        compiler_params=pltpu.CompilerParams(
            dimension_semantics=("parallel", "parallel")
        ),
    )(xc, wc)

    # --- out = adj @ support (+ bias) ----------------------------------------
    grid = (n_pad // tile_m, n_pad // tile_k)

    per_step = base_bytes + sup_bytes
    vmem_limit = int(min(max(per_step + (8 << 20), 32 << 20), 48 << 20))

    cparams = pltpu.CompilerParams(
        dimension_semantics=("parallel", "arbitrary"),
        vmem_limit_bytes=vmem_limit,
    )

    if sup_resident:
        sup_spec = pl.BlockSpec((n_pad, f_pad), lambda i, k: (0, 0))
    else:
        # TODO(synk): when support does not fit VMEM, widen tile_m to halve
        # the support re-reads instead of re-DMA'ing it per (i, k) step.
        sup_spec = pl.BlockSpec((tile_k, f_pad), lambda i, k: (k, 0))

    in_specs = [
        pl.BlockSpec((tile_m, tile_k), lambda i, k: (i, k)),
        sup_spec,
    ]
    operands = [adjc, support]

    if has_bias:
        bias2d = _maybe_cast_pad(
            bias.reshape(1, f_out), jnp.float32, ((0, 0), (0, f_pad - f_out))
        )
        in_specs.append(pl.BlockSpec((1, f_pad), lambda i, k: (0, 0)))
        operands.append(bias2d)

    scratch_shapes = [] if acc_in_out else [pltpu.VMEM((tile_m, f_pad), jnp.float32)]

    # TODO(synk): for very large F_out (>~4K) add a third grid axis tiling f_pad
    # (out/acc/support blocks scale with f_pad; needed for v7x's 64 MiB VMEM).
    out_pad = pl.pallas_call(
        _make_agg_kernel(tile_k, sup_resident, has_bias, acc_in_out),
        out_shape=jax.ShapeDtypeStruct((n_pad, f_pad), out_dtype),
        grid=grid,
        in_specs=in_specs,
        out_specs=pl.BlockSpec((tile_m, f_pad), lambda i, k: (i, 0)),
        scratch_shapes=scratch_shapes,
        compiler_params=cparams,
    )(*operands)

    if n_pad == n and f_pad == f_out:
        return out_pad
    return out_pad[:n, :f_out]


def init_gcn_params(key, in_features, out_features, bias=True, dtype=jnp.float32):
    """Deterministic equivalent of GraphConvolution.reset_parameters()."""
    stdv = 1.0 / math.sqrt(out_features)
    k_w, k_b = jax.random.split(key)
    weight = jax.random.uniform(
        k_w, (in_features, out_features), dtype=dtype, minval=-stdv, maxval=stdv
    )
    b = (
        jax.random.uniform(k_b, (out_features,), dtype=dtype, minval=-stdv, maxval=stdv)
        if bias
        else None
    )
    return weight, b


if __name__ == "__main__":
    key = jax.random.PRNGKey(0)
    k_x, k_adj, k_p = jax.random.split(key, 3)

    # Deliberately non-multiples of 128 to exercise the padding/slicing path.
    N = 200       # number of graph nodes
    F_IN = 48     # in_features
    F_OUT = 96    # out_features

    x = jax.random.normal(k_x, (N, F_IN), dtype=jnp.float32)

    # Symmetric, row-normalized dense adjacency (as torch.spmm would use, densified).
    raw = (jax.random.uniform(k_adj, (N, N)) < 0.1).astype(jnp.float32)
    adj = raw + raw.T + jnp.eye(N, dtype=jnp.float32)
    adj = adj / jnp.clip(adj.sum(axis=1, keepdims=True), 1.0, None)

    weight, bias = init_gcn_params(k_p, F_IN, F_OUT, bias=True)

    # --- f32 path (default; strict parity with the PyTorch reference) ---
    out = jax.block_until_ready(gcn_forward(x, adj, weight, bias))
    assert out.shape == (N, F_OUT)
    ref = adj @ (x @ weight) + bias[None, :]
    assert jnp.allclose(out, ref, atol=2e-2, rtol=2e-2), "f32 path mismatch"

    # --- no-bias path ---
    out_nb = jax.block_until_ready(gcn_forward(x, adj, weight, None))
    ref_nb = adj @ (x @ weight)
    assert jnp.allclose(out_nb, ref_nb, atol=2e-2, rtol=2e-2), "no-bias path mismatch"

    # --- bf16 compute path (reduced adj HBM traffic) ---
    out_bf = jax.block_until_ready(
        gcn_forward(x, adj, weight, bias, compute_dtype=jnp.bfloat16)
    )
    cd = jnp.bfloat16
    sup_ref = jnp.dot(
        x.astype(cd), weight.astype(cd), preferred_element_type=jnp.float32
    ).astype(cd)
    ref_bf = jnp.dot(adj.astype(cd), sup_ref, preferred_element_type=jnp.float32)
    ref_bf = ref_bf + bias[None, :].astype(jnp.float32)
    assert jnp.allclose(out_bf, ref_bf, atol=2e-2, rtol=2e-2), "bf16 path mismatch"

    print("KERNEL_OK")
</pallas_src>

<mosaic_0001>
module attributes {stable_mosaic.version = 11 : i64} {
  func.func @_support_kernel(%arg0: i32, %arg1: i32, %arg2: memref<128x128xf32, #tpu.memory_space<vmem>>, %arg3: memref<128x128xf32, #tpu.memory_space<vmem>>, %arg4: memref<128x128xf32, #tpu.memory_space<vmem>>) attributes {dimension_semantics = [#tpu.dimension_semantics<parallel>, #tpu.dimension_semantics<parallel>], iteration_bounds = array<i64: 2, 1>, scalar_prefetch = 0 : i64, scratch_operands = 0 : i64, tpu.core_type = #tpu.core_type<tc>, window_params = [{transform_indices = @transform_0, window_bounds = array<i64: 128, 128>}, {transform_indices = @transform_1, window_bounds = array<i64: 128, 128>}, {transform_indices = @transform_2, window_bounds = array<i64: 128, 128>}]} {
    %c0 = arith.constant 0 : index
    %c0_0 = arith.constant 0 : index
    %0 = vector.load %arg2[%c0, %c0_0] : memref<128x128xf32, #tpu.memory_space<vmem>>, vector<128x128xf32>
    %c0_1 = arith.constant 0 : index
    %c0_2 = arith.constant 0 : index
    %1 = vector.load %arg3[%c0_1, %c0_2] : memref<128x128xf32, #tpu.memory_space<vmem>>, vector<128x128xf32>
    %cst = arith.constant dense<0.000000e+00> : vector<128x128xf32>
    %2 = tpu.matmul %0, %1, %cst {dimension_numbers = #tpu.dot_dimension_numbers<[1], [0], [0], [1], [0, 0, 1, 1], [], []>} : vector<128x128xf32>, vector<128x128xf32>, vector<128x128xf32> -> vector<128x128xf32>
    %c0_3 = arith.constant 0 : index
    %c0_4 = arith.constant 0 : index
    %3 = vector.load %arg4[%c0_3, %c0_4] : memref<128x128xf32, #tpu.memory_space<vmem>>, vector<128x128xf32>
    tpu.vector_store %arg4[%c0_3, %c0_4], %2 {strides = array<i32>} : memref<128x128xf32, #tpu.memory_space<vmem>>, vector<128x128xf32>,
    return
  }
  func.func @transform_0(%arg0: i32, %arg1: i32) -> (i32, i32) {
    %c0_i32 = arith.constant 0 : i32
    %c0_i32_0 = arith.constant 0 : i32
    return %arg0, %c0_i32 : i32, i32
  }
  func.func @transform_1(%arg0: i32, %arg1: i32) -> (i32, i32) {
    %c0_i32 = arith.constant 0 : i32
    %c0_i32_0 = arith.constant 0 : i32
    return %c0_i32, %arg1 : i32, i32
  }
  func.func @transform_2(%arg0: i32, %arg1: i32) -> (i32, i32) {
    %c0_i32 = arith.constant 0 : i32
    return %arg0, %arg1 : i32, i32
  }
}

</mosaic_0001>

<bundles_post_ra>
// kernel: tpu_custom_call.1
= control target key start
LH: loop header
LB: loop body
LE: loop exit
PB: predicated region body
PF: predicated region fallthrough
CT: control target
= control target key end

     0   :  { %7 = vsyncpa [#allocation3], 0  ;;  %s1109_s0 = inlined_call_operand.hbm [shape: f32[256,128], index: 0, kind: input, shape index: {}]   ;;  %s1110_s1 = inlined_call_operand.hbm [shape: f32[128,128], index: 1, kind: input, shape index: {}]   ;;  %s1111_s2 = inlined_call_operand.hbm [shape: f32[256,128], index: 2, kind: output, shape index: {}]  }
   0x1   :  { %9 = vsyncpa [#allocation3 + $0x1], 0 }
   0x2   :  { %10 = vsyncpa [#allocation6], 0 }
   0x3   :  { %11 = vsyncpa [#allocation4], 0 }
   0x4   :  { %13 = vsyncpa [#allocation4 + $0x1], 0  ;;  %s881_s9 = smov 0   ;;  %s883_s10 = smov 0  }
   0x5   :  { %s885_s11 = smov 0   ;;  %s887_s12 = smov 0  }
   0x6   :  { %s889_s13 = smov 0   ;;  %s891_s14 = smov 0  }
   0x7 LB: > { %s503_s15 = sadd.s32 4294967295, %s857_s14   ;;  %s504_s16 = sadd.s32 4294967294, %s857_s14   ;;  %s857_s14 = sphi %s891_s14, %s19_s14   ;;  %s853_s13 = sphi %s889_s13, %s1131_s13   ;;  %s849_s12 = sphi %s887_s12, %s1130_s12   ;;  %s845_s11 = sphi %s885_s11, %s1129_s11   ;;  %s841_s10 = sphi %s883_s10, %s1128_s10   ;;  %s837_s9 = sphi %s881_s9, %s1127_s9  }
   0x8   : > { %p51_p0 = scmp.ne.s32.totalorder %s841_s10, %s837_s9  ;;  %p915_p1 = scmp.eq.s32.totalorder %s503_s15, 0 }
   0x9   : > { %p919_p2 = scmp.eq.s32.totalorder %s503_s15, 1  ;;  %p109_p3 = scmp.eq.s32.totalorder %s504_s16, 1 }
   0xa   : > { %p925_p4 = por %p915_p1, %p51_p0  ;;  %p505_p5 = scmp.ge.s32.totalorder %s857_s14, 1 }
   0xb   : > { %p930_p6 = por %p109_p3, %p51_p0  ;;  %p116_p7 = scmp.lt.s32.totalorder %s857_s14, 3 }
   0xc   : > { %s1116_s19 = scalar_select %p925_p4, 1, 0 }
   0xd   : > { %s1117_s20 = scalar_select %p930_p6, 1, 0 }
   0xe   : > { %p935_p8 = pnand %p505_p5, %p116_p7  ;;  %s859_s22 = smov [#allocation5]  }
   0xf   : > { %s130_s23 = sshll.u32 %s859_s22, 4  ;;  %s31_s25 = sadd.s32 1, %s853_s13  ;;  %s131_s23 = int_to_ptr.vmem [resolvable:$true] %s130_s23 }
  0x10   : > { %p650_p9 = pneg %p935_p8  ;;  %s730_s26 = scalar_lea.vmem %s131_s23, 2048 }
  0x11   : > { %p731_p13 = scmp.ne.s32.totalorder %s131_s23, %s730_s26  ;;  %p738_p5 = scmp.lt.s32.totalorder %s131_s23, %s131_s23 }
  0x12   : > { %p944_p11 = pnand %p650_p9, %p915_p1  ;;  %p739_p7 = scmp.lt.s32.totalorder %s730_s26, %s730_s26 }
  0x14   : > { %p721_p12 = pneg %p944_p11  ;;  %p740_p6 = por %p739_p7, %p738_p5 }
  0x16   : > { %p733_p0 = pnand %p731_p13, %p721_p12 }
  0x18   : > { %p734_p3 = pneg %p733_p0 }
  0x1a   : > { %p741_p4 = pnand %p740_p6, %p734_p3 }
  0x1c   : > { %744 = shalt.err (!%p741_p4)
}
  0x1d   : > { %s1113_s27 = smov 128   ;;  %s861_s28 = smov 8  }
  0x1e   : > { %653 = dma.hbm_to_vmem [thread:$0]  (!%p944_p11), %s1110_s1, 2048, %s131_s23, [#allocation6], %s1113_s27, %s1113_s27, %s861_s28  }
  0x1f   : > { %p33_p4 = scmp.ge.s32.totalorder %s31_s25, 2  ;;  %s38_s3 = sadd.s32 1, %s845_s11 }
  0x20   : > { %p45_p6 = scmp.ne.s32.totalorder %s845_s11, %s841_s10  ;;  %p46_p9 = scmp.eq.s32.totalorder %s857_s14, 0 }
  0x21   : > { %s1133_s25 = smov (%p33_p4, %s31_s25), 0  ;;  %p663_p0 = scmp.lt.s32.totalorder %s857_s14, 2 }
  0x22   : > { %p965_p12 = por %p46_p9, %p45_p6  ;;  %p971_p13 = por %p919_p2, %p45_p6 }
  0x23   : > { %s35_s6 = ssub.s32 %s853_s13, %s1133_s25  ;;  %s144_s7 = sand.u32 1, %s845_s11  }
  0x24   : > { %p36_p11 = scmp.eq.s32.totalorder %s35_s6, 0  ;;  %s508_s8 = sshll.u32 %s144_s7, 7 }
  0x25   : > { %s520_s16 = sshll.u32 %s853_s13, 11  ;;  %s148_s26 = scalar_lea.vmem [#allocation2], %s508_s8 }
  0x26   : > { %s980_s15 = scalar_select %p36_p11, %s845_s11, %s38_s3  }
  0x27   : > { %s154_s24 = scalar_lea.hbm %s1109_s0, %s520_s16  ;;  %s155_s29 = sshll.u32 %s148_s26, 4  ;;  %s156_s29 = int_to_ptr.vmem [resolvable:$true] %s155_s29 }
  0x28   : > { %p988_p2 = pnand %p663_p0, %p965_p12  ;;  %s145_s30 = scalar_lea.sflag [#allocation3], %s144_s7 }
  0x29   : > { %s758_s6 = scalar_lea.vmem %s156_s29, 2048  ;;  %s862_s3 = smov [#allocation2]  }
  0x2a   : > { %p747_p3 = pneg %p988_p2  ;;  %p759_p5 = scmp.ne.s32.totalorder %s156_s29, %s758_s6 }
  0x2b   : > { %s763_s27 = sshll.u32 %s862_s3, 4  ;;  %s764_s27 = int_to_ptr.vmem [resolvable:$false] %s763_s27 }
  0x2c   : > { %p761_p7 = pnand %p759_p5, %p747_p3  ;;  %s765_s16 = scalar_lea.vmem %s764_s27, 4096 }
  0x2d   : > { %p766_p6 = scmp.lt.s32.totalorder %s156_s29, %s764_s27  ;;  %p767_p9 = scmp.lt.s32.totalorder %s765_s16, %s758_s6 }
  0x2e   : > { %p762_p4 = pneg %p761_p7 }
  0x2f   : > { %p768_p11 = por %p767_p9, %p766_p6 }
  0x31   : > { %p769_p10 = pnand %p768_p11, %p762_p4 }
  0x33   : > { %772 = shalt.err (!%p769_p10)
}
  0x34   : > { %s1123_s4 = smov 128   ;;  %167 = sbr.rel (%p935_p8) target bundleno = 315 (0x13b), region = 28 }
  0x35   : > { %657 = dma.hbm_to_vmem [thread:$0]  (!%p988_p2), %s154_s24, 2048, %s156_s29, %s145_s30, %s1123_s4, %s1123_s4, %s861_s28  }
  0x36   : > { %s1002_s7 = sand.u32 (!%p935_p8), 1, %s841_s10   ;;  %p1124_p10 = scmp.ne.s32.totalorder (!%p935_p8), %s1116_s19, 0 }
  0x37   : > { %s512_s27 = sshll.u32 (!%p935_p8), %s1002_s7, 7  ;;  %s170_s8 = scalar_lea.sflag (!%p935_p8), [#allocation3], %s1002_s7 }
  0x38   : > { %s1008_s22 = scalar_lea.vmem (!%p935_p8), [#allocation2], %s512_s27 }
  0x39   : > { %824 = dma.done.wait (%p1124_p10), %s170_s8, 2048  }
  0x3a   : > { %826 = vsyncadd (%p1124_p10), %s170_s8, 4294965248 }
  0x3b   : > { %828 = dma.done.wait (%p915_p1), [#allocation6], 2048  }
  0x3c   : > { %830 = vsyncadd (%p915_p1), [#allocation6], 4294965248  ;;  %v231_v0 = vld [vmem:[#allocation5 + $0x78] sm:$0xff]  ;;  %v230_v1 = vld [vmem:[#allocation5 + $0x70] sm:$0xff]  ;;  %s1036_s17 = scalar_lea.vmem [#allocation7], %s512_s27  ;;  %s521_s19 = sshll.u32 %s849_s12, 11 }
  0x3d   : > { %554 = vmatprep.subr.mxu0 %v231_v0  ;;  %610 = vmatprep.subr.mxu1 %v231_v0  ;;  %v229_v2 = vld [vmem:[#allocation5 + $0x68] sm:$0xff]  ;;  %v228_v3 = vld [vmem:[#allocation5 + $0x60] sm:$0xff]  ;;  %v227_v4 = vld [vmem:[#allocation5 + $0x58] sm:$0xff]  ;;  %s408_s21 = sshll.u32 %s1036_s17, 4  ;;  %s1055_s24 = scalar_lea.hbm %s1111_s2, %s521_s19  ;;  %s1057_s21 = int_to_ptr.vmem [resolvable:$true] %s408_s21 }
  0x3e   : > { %555 = vmatpush3.msra.mxu0 %v231_v0  ;;  %626 = vmatpush3.msra.mxu1 %v231_v0  ;;  %v226_v5 = vld [vmem:[#allocation5 + $0x50] sm:$0xff]  ;;  %v225_v6 = vld [vmem:[#allocation5 + $0x48] sm:$0xff]  ;;  %v224_v7 = vld [vmem:[#allocation5 + $0x40] sm:$0xff]  ;;  %s394_s12 = scalar_lea.sflag [#allocation4], %s1002_s7  ;;  %s773_s26 = scalar_lea.vmem %s1057_s21, 2048 }
  0x3f   : > { %556 = vmatprep.subr.mxu0 %v230_v1  ;;  %611 = vmatprep.subr.mxu1 %v230_v1  ;;  %v223_v8 = vld [vmem:[#allocation5 + $0x38] sm:$0xff]  ;;  %v222_v9 = vld [vmem:[#allocation5 + $0x30] sm:$0xff]  ;;  %v221_v10 = vld [vmem:[#allocation5 + $0x28] sm:$0xff]  ;;  %p774_p1 = scmp.ne.s32.totalorder %s1057_s21, %s773_s26  ;;  %s863_s29 = smov [#allocation7]  }
  0x40   : > { %557 = vmatpush3.msra.mxu0 %v230_v1  ;;  %627 = vmatpush3.msra.mxu1 %v230_v1  ;;  %v220_v11 = vld [vmem:[#allocation5 + $0x20] sm:$0xff]  ;;  %v219_v12 = vld [vmem:[#allocation5 + $0x18] sm:$0xff]  ;;  %v218_v13 = vld [vmem:[#allocation5 + $0x10] sm:$0xff]  ;;  %s777_s18 = sshll.u32 %s863_s29, 4  ;;  %s778_s18 = int_to_ptr.vmem [resolvable:$false] %s777_s18 }
  0x41   : > { %558 = vmatprep.subr.mxu0 %v229_v2  ;;  %612 = vmatprep.subr.mxu1 %v229_v2  ;;  %v217_v14 = vld [vmem:[#allocation5 + $0x8] sm:$0xff]  ;;  %v216_v15 = vld [vmem:[#allocation5] sm:$0xff]  ;;  %v202_v20 = vld [vmem:[%s1008_s22 + $0x10] sm:$0xff]  ;;  %p775_p8 = pnand %p774_p1, %p971_p13  ;;  %s779_s30 = scalar_lea.vmem %s778_s18, 4096 }
  0x42   : > { %559 = vmatpush3.msra.mxu0 %v229_v2  ;;  %628 = vmatpush3.msra.mxu1 %v229_v2  ;;  %v200_v16 = vld [vmem:[%s1008_s22] sm:$0xff]  ;;  %v201_v18 = vld [vmem:[%s1008_s22 + $0x8] sm:$0xff]  ;;  %v210_v21 = vld [vmem:[%s1008_s22 + $0x50] sm:$0xff]  ;;  %p780_p0 = scmp.lt.s32.totalorder %s1057_s21, %s778_s18  ;;  %p781_p2 = scmp.lt.s32.totalorder %s779_s30, %s773_s26 }
  0x43   : > { %560 = vmatprep.subr.mxu0 %v228_v3  ;;  %613 = vmatprep.subr.mxu1 %v228_v3  ;;  %v208_v17 = vld [vmem:[%s1008_s22 + $0x40] sm:$0xff]  ;;  %v209_v19 = vld [vmem:[%s1008_s22 + $0x48] sm:$0xff]  ;;  %v203_v22 = vld [vmem:[%s1008_s22 + $0x18] sm:$0xff]  ;;  %p776_p12 = pneg %p775_p8 }
  0x44   : > { %561 = vmatpush3.msra.mxu0 %v228_v3  ;;  %629 = vmatpush3.msra.mxu1 %v228_v3  ;;  %v211_v23 = vld [vmem:[%s1008_s22 + $0x58] sm:$0xff]  ;;  %v204_v24 = vld [vmem:[%s1008_s22 + $0x20] sm:$0xff]  ;;  %v205_v26 = vld [vmem:[%s1008_s22 + $0x28] sm:$0xff]  ;;  %p782_p3 = por %p781_p2, %p780_p0 }
  0x45   : > { %562 = vmatprep.subr.mxu0 %v227_v4  ;;  %614 = vmatprep.subr.mxu1 %v227_v4  ;;  %v212_v25 = vld [vmem:[%s1008_s22 + $0x60] sm:$0xff]  ;;  %v213_v27 = vld [vmem:[%s1008_s22 + $0x68] sm:$0xff]  ;;  %v206_v28 = vld [vmem:[%s1008_s22 + $0x30] sm:$0xff] }
  0x46   : > { %563 = vmatpush3.msra.mxu0 %v227_v4  ;;  %630 = vmatpush3.msra.mxu1 %v227_v4  ;;  %v214_v29 = vld [vmem:[%s1008_s22 + $0x70] sm:$0xff]  ;;  %v207_v30 = vld [vmem:[%s1008_s22 + $0x38] sm:$0xff]  ;;  %p783_p5 = pnand %p782_p3, %p776_p12 }
  0x47   : > { %564 = vmatprep.subr.mxu0 %v226_v5  ;;  %615 = vmatprep.subr.mxu1 %v226_v5  ;;  %v215_v31 = vld [vmem:[%s1008_s22 + $0x78] sm:$0xff] }
  0x48   : > { %565 = vmatpush3.msra.mxu0 %v226_v5  ;;  %631 = vmatpush3.msra.mxu1 %v226_v5 }
  0x49   : > { %566 = vmatprep.subr.mxu0 %v225_v6  ;;  %616 = vmatprep.subr.mxu1 %v225_v6 }
  0x4a   : > { %567 = vmatpush3.msra.mxu0 %v225_v6  ;;  %632 = vmatpush3.msra.mxu1 %v225_v6 }
  0x4b   : > { %568 = vmatprep.subr.mxu0 %v224_v7  ;;  %617 = vmatprep.subr.mxu1 %v224_v7 }
  0x4c   : > { %569 = vmatpush3.msra.mxu0 %v224_v7  ;;  %633 = vmatpush3.msra.mxu1 %v224_v7 }
  0x4d   : > { %570 = vmatprep.subr.mxu0 %v223_v8  ;;  %618 = vmatprep.subr.mxu1 %v223_v8 }
  0x4e   : > { %571 = vmatpush3.msra.mxu0 %v223_v8  ;;  %634 = vmatpush3.msra.mxu1 %v223_v8 }
  0x4f   : > { %572 = vmatprep.subr.mxu0 %v222_v9  ;;  %619 = vmatprep.subr.mxu1 %v222_v9 }
  0x50   : > { %573 = vmatpush3.msra.mxu0 %v222_v9  ;;  %635 = vmatpush3.msra.mxu1 %v222_v9 }
  0x51   : > { %574 = vmatprep.subr.mxu0 %v221_v10  ;;  %620 = vmatprep.subr.mxu1 %v221_v10 }
  0x52   : > { %575 = vmatpush3.msra.mxu0 %v221_v10  ;;  %636 = vmatpush3.msra.mxu1 %v221_v10 }
  0x53   : > { %576 = vmatprep.subr.mxu0 %v220_v11  ;;  %621 = vmatprep.subr.mxu1 %v220_v11 }
  0x54   : > { %577 = vmatpush3.msra.mxu0 %v220_v11  ;;  %637 = vmatpush3.msra.mxu1 %v220_v11 }
  0x55   : > { %578 = vmatprep.subr.mxu0 %v219_v12  ;;  %622 = vmatprep.subr.mxu1 %v219_v12 }
  0x56   : > { %579 = vmatpush3.msra.mxu0 %v219_v12  ;;  %638 = vmatpush3.msra.mxu1 %v219_v12 }
  0x57   : > { %580 = vmatprep.subr.mxu0 %v218_v13  ;;  %623 = vmatprep.subr.mxu1 %v218_v13 }
  0x58   : > { %581 = vmatpush3.msra.mxu0 %v218_v13  ;;  %639 = vmatpush3.msra.mxu1 %v218_v13 }
  0x59   : > { %582 = vmatprep.subr.mxu0 %v217_v14  ;;  %624 = vmatprep.subr.mxu1 %v217_v14 }
  0x5a   : > { %583 = vmatpush3.msra.mxu0 %v217_v14  ;;  %640 = vmatpush3.msra.mxu1 %v217_v14 }
  0x5b   : > { %584 = vmatprep.subr.mxu0 %v216_v15  ;;  %625 = vmatprep.subr.mxu1 %v216_v15 }
  0x5c   : > { %585 = vmatpush3.msra.mxu0 %v216_v15  ;;  %641 = vmatpush3.msra.mxu1 %v216_v15 }
  0x5d   : > { %586 = vmatprep.mubr.f32.mxu0 %v200_v16  ;;  %598 = vmatprep.mubr.f32.mxu1 %v208_v17 }
  0x5e   : > { %587 = vmatmul.mubr.f32.vlgmr.msra.gmra.mxu0 %v201_v18  ;;  %599 = vmatmul.mubr.f32.vlgmr.msra.gmra.mxu1 %v209_v19 }
  0x5f   : > { %589 = vmatprep.mubr.f32.mxu0 %v202_v20  ;;  %601 = vmatprep.mubr.f32.mxu1 %v210_v21 }
  0x62   : > { %590 = vmatmul.mubr.f32.gmra.mxu0 %v203_v22  ;;  %602 = vmatmul.mubr.f32.gmra.mxu1 %v211_v23 }
  0x63   : > { %592 = vmatprep.mubr.f32.mxu0 %v204_v24  ;;  %604 = vmatprep.mubr.f32.mxu1 %v212_v25 }
  0x66   : > { %593 = vmatmul.mubr.f32.gmra.mxu0 %v205_v26  ;;  %605 = vmatmul.mubr.f32.gmra.mxu1 %v213_v27 }
  0x67   : > { %595 = vmatprep.mubr.f32.mxu0 %v206_v28  ;;  %607 = vmatprep.mubr.f32.mxu1 %v214_v29 }
  0x6a   : > { %596 = vmatmul.mubr.f32.gmra.mxu0 %v207_v30  ;;  %608 = vmatmul.mubr.f32.gmra.mxu1 %v215_v31 }
 0x11e   : > { %v588_v32 = vpop.f32.mrf.mxu0  ;;  %v600_v33 = vpop.f32.mrf.mxu1 }
 0x11f   : > { %378 = vst [vmem:[%s1036_s17 + $0x8] sm:$0xff] %v588_v32  ;;  %386 = vst [vmem:[%s1036_s17 + $0x48] sm:$0xff] %v600_v33 }
 0x120   : > { %v298_v34 = vpop.f32.mrf.mxu0  ;;  %v338_v35 = vpop.f32.mrf.mxu1 }
 0x121   : > { %377 = vst [vmem:[%s1036_s17] sm:$0xff] %v298_v34  ;;  %385 = vst [vmem:[%s1036_s17 + $0x40] sm:$0xff] %v338_v35 }
 0x122   : > { %v591_v36 = vpop.f32.mrf.mxu0  ;;  %v603_v37 = vpop.f32.mrf.mxu1 }
 0x123   : > { %380 = vst [vmem:[%s1036_s17 + $0x18] sm:$0xff] %v591_v36  ;;  %388 = vst [vmem:[%s1036_s17 + $0x58] sm:$0xff] %v603_v37 }
 0x124   : > { %v308_v38 = vpop.f32.mrf.mxu0  ;;  %v348_v39 = vpop.f32.mrf.mxu1 }
 0x125   : > { %379 = vst [vmem:[%s1036_s17 + $0x10] sm:$0xff] %v308_v38  ;;  %387 = vst [vmem:[%s1036_s17 + $0x50] sm:$0xff] %v348_v39 }
 0x126   : > { %v594_v40 = vpop.f32.mrf.mxu0  ;;  %v606_v41 = vpop.f32.mrf.mxu1 }
 0x127   : > { %382 = vst [vmem:[%s1036_s17 + $0x28] sm:$0xff] %v594_v40  ;;  %390 = vst [vmem:[%s1036_s17 + $0x68] sm:$0xff] %v606_v41 }
 0x128   : > { %v318_v42 = vpop.f32.mrf.mxu0  ;;  %v358_v43 = vpop.f32.mrf.mxu1 }
 0x129   : > { %381 = vst [vmem:[%s1036_s17 + $0x20] sm:$0xff] %v318_v42  ;;  %389 = vst [vmem:[%s1036_s17 + $0x60] sm:$0xff] %v358_v43 }
 0x12a   : > { %v597_v44 = vpop.f32.mrf.mxu0  ;;  %v609_v45 = vpop.f32.mrf.mxu1 }
 0x12b   : > { %384 = vst [vmem:[%s1036_s17 + $0x38] sm:$0xff] %v597_v44  ;;  %392 = vst [vmem:[%s1036_s17 + $0x78] sm:$0xff] %v609_v45 }
 0x12c   : > { %v328_v46 = vpop.f32.mrf.mxu0  ;;  %v368_v47 = vpop.f32.mrf.mxu1 }
 0x12d   : > { %383 = vst [vmem:[%s1036_s17 + $0x30] sm:$0xff] %v328_v46  ;;  %391 = vst [vmem:[%s1036_s17 + $0x70] sm:$0xff] %v368_v47 }
 0x12e   : > { %786 = shalt.err (!%p783_p5)
}
 0x12f   : > { %s787_s6 = scalar_lea.hbm %s1055_s24, 2048  ;;  %s791_s4 = scalar_lea.hbm %s1111_s2, 4096 }
 0x130   : > { %p788_p7 = scmp.ne.s32.totalorder %s1055_s24, %s787_s6  ;;  %p792_p9 = scmp.lt.s32.totalorder %s1055_s24, %s1111_s2 }
 0x131   : > { %p793_p11 = scmp.lt.s32.totalorder %s791_s4, %s787_s6 }
 0x132   : > { %p789_p4 = pnand %p788_p7, %p971_p13 }
 0x133   : > { %p794_p10 = por %p793_p11, %p792_p9 }
 0x134   : > { %p790_p6 = pneg %p789_p4 }
 0x136   : > { %p795_p1 = pnand %p794_p10, %p790_p6 }
 0x138   : > { %798 = shalt.err (!%p795_p1)
}
 0x139   : > { %s864_s22 = smov 128   ;;  %s865_s17 = smov 8  }
 0x13a   : > { %648 = dma.vmem_to_hbm [thread:$0]  (%p971_p13), %s1057_s21, 2048, %s1055_s24, %s394_s12, %s864_s22, %s864_s22, %s865_s17  }
 0x13b PF: > { %s423_s19 = sand.u32 1, %s837_s9   ;;  %p1125_p8 = scmp.ne.s32.totalorder %s1117_s20, 0 }
 0x13c   : > { %p1126_p12 = scmp.ge.s32.totalorder %s857_s14, 2  ;;  %s424_s28 = scalar_lea.sflag [#allocation4], %s423_s19 }
 0x13e   : > { %p659_p0 = pnand %p1126_p12, %p1125_p8 }
 0x140   : > { %p660_p2 = pneg %p659_p0 }
 0x142   : > { %832 = dma.done.wait (%p660_p2), %s424_s28, 2048  }
 0x143   : > { %834 = vsyncadd (%p660_p2), %s424_s28, 4294965248  ;;  %s19_s14 = sadd.s32 1, %s857_s14   ;;  %s1127_s9 = smov %s841_s10 }
 0x144   : > { %p16_p3 = scmp.ge.s32.totalorder %s19_s14, 4   ;;  %s1128_s10 = smov %s845_s11 }
 0x145   : > { %s1129_s11 = smov %s980_s15  ;;  %s1130_s12 = smov %s853_s13 }
 0x146   : > { %s1131_s13 = smov %s1133_s25  ;;  %18 = sbr.rel (!%p16_p3) target bundleno = 7 (0x7), region = 78 }
 0x14b   :  { %429 = vsyncpa [#allocation3], 1 }
 0x14c   :  { %431 = vsyncpa [#allocation3 + $0x1], 1 }
 0x14d   :  { %432 = vsyncpa [#allocation6], 1 }
 0x14e   :  { %433 = vsyncpa [#allocation4], 1 }
 0x14f   :  { %435 = vsyncpa [#allocation4 + $0x1], 1 }

</bundles_post_ra>
